<compile_context>
chip_gen: v5e
topology: v5e:2x2
jax: 0.10.0
libtpu: 0.0.40
codegen_flags: <defaults>
</compile_context>

<pallas_src>
import jax
import jax.numpy as jnp
from jax.experimental import pallas as pl
from jax.experimental.pallas import tpu as pltpu

_LANE = 128
_SUBLANE = 8


def _make_ae_kernel(n_encoder, n_layers):
    """Build an AE forward kernel for a fixed layer count (unrolled at trace time).

    Ref order: x, (w, b) * n_layers, mindata, maxdata, out.
    """

    def kernel(*refs):
        x_ref = refs[0]
        param_refs = refs[1:1 + 2 * n_layers]
        min_ref = refs[1 + 2 * n_layers]
        max_ref = refs[2 + 2 * n_layers]
        o_ref = refs[3 + 2 * n_layers]

        h = x_ref[...].astype(jnp.float32)                    # (TM, D)
        for li in range(n_layers):
            w = param_refs[2 * li][...].astype(jnp.float32)   # (in, out)
            b = param_refs[2 * li + 1][...]                   # (1, out)  f32
            z = jnp.dot(h, w, preferred_element_type=jnp.float32) + b
            if li < n_encoder:
                h = jnp.tanh(z)                               # encoder: Linear + Tanh
            elif li < n_layers - 1:
                h = z                                         # decoder hidden: Linear only
            else:
                h = jax.nn.sigmoid(z)                         # decoder last: Linear + Sigmoid

        # DecX = mindata + (maxdata - mindata) * DecX
        out = min_ref[...] + (max_ref[...] - min_ref[...]) * h
        o_ref[...] = out.astype(o_ref.dtype)

    return kernel


def _choose_tile(batch, block_m, min_steps):
    """Pick rows-per-step.  Prefer a divisor of `batch` (no jnp.pad HBM copy),
    keep tm a multiple of 8, and leave >= min_steps grid steps when possible."""
    cap = min(block_m, batch)
    if batch >= min_steps * _SUBLANE:
        cap = min(cap, max(_SUBLANE, (batch // min_steps) // _SUBLANE * _SUBLANE))
    if cap >= batch:
        return batch, 0                       # single full-array block
    cap = max(_SUBLANE, cap - cap % _SUBLANE)
    t = cap
    while t >= _SUBLANE:                      # largest multiple-of-8 divisor of batch
        if batch % t == 0:
            return t, 0
        t -= _SUBLANE
    return cap, (-batch) % cap                # fallback: ragged tail -> pad


def ae_forward(x, params, mindata, maxdata, *, block_m=512, out_dtype=jnp.float32,
               vmem_budget_bytes=48 << 20, min_grid_steps=4):
    """x: (B, inputDim). Returns (B, out_dim) in `out_dtype`.

    block_m: max rows per grid step. 512 is a good default on all current
    generations (mem-bound kernel: bigger tiles amortize the ~0.35 us/step
    overhead); it is further capped so >= `min_grid_steps` steps exist (v7x
    megacore) and so double-buffered blocks stay under `vmem_budget_bytes`
    (fits v7x's 64 MiB VMEM). Pass x in bf16 to halve input HBM traffic;
    compute stays f32.
    """
    enc = list(params["encoder"])
    dec = list(params["decoder"])
    layers = enc + dec
    n_enc = len(enc)
    n_layers = len(layers)

    B, D = x.shape
    out_dim = int(layers[-1][0].shape[1])

    # ---- lane-dense output: pad last layer / min / max to a multiple of 128 ----
    out_pad = (-out_dim) % _LANE
    out_padded = out_dim + out_pad
    min2d = jnp.asarray(mindata, jnp.float32).reshape(1, -1)
    max2d = jnp.asarray(maxdata, jnp.float32).reshape(1, -1)
    if out_pad:
        w_last, b_last = layers[-1]
        layers = layers[:-1] + [(
            jnp.pad(w_last, ((0, 0), (0, out_pad))),
            jnp.pad(b_last, ((0, 0), (0, out_pad))))]
        min2d = jnp.pad(min2d, ((0, 0), (0, out_pad)))
        max2d = jnp.pad(max2d, ((0, 0), (0, out_pad)))

    # ---- VMEM budget: resident params + double-buffered X / out blocks ----
    resident_bytes = sum(int(w.size) * w.dtype.itemsize + int(b.size) * b.dtype.itemsize
                         for w, b in layers)
    resident_bytes += 2 * out_padded * 4
    per_row_bytes = 2 * D * x.dtype.itemsize + 2 * out_padded * jnp.dtype(out_dtype).itemsize
    avail = max(vmem_budget_bytes - resident_bytes - (2 << 20), per_row_bytes * _SUBLANE)
    tm_vmem_cap = max(_SUBLANE, (avail // per_row_bytes) // _SUBLANE * _SUBLANE)

    tm, pad = _choose_tile(B, min(block_m, tm_vmem_cap), min_grid_steps)
    if pad:
        # TODO(synk): fallback only — a ragged batch materializes one extra HBM
        # pass over X; prefer batch sizes with a multiple-of-8 divisor <= block_m.
        x = jnp.pad(x, ((0, pad), (0, 0)))
    bp = B + pad
    grid = (bp // tm,)

    vmem_limit = int(min(max(resident_bytes + per_row_bytes * tm + (4 << 20), 32 << 20),
                         60 << 20))

    # ---- specs: X / out streamed over the batch grid; params stay resident ----
    def resident(arr):
        return pl.BlockSpec(arr.shape, lambda i: (0, 0))

    in_specs = [pl.BlockSpec((tm, D), lambda i: (i, 0))]
    inputs = [x]
    for w, b in layers:
        in_specs += [resident(w), resident(b)]
        inputs += [w, b]
    in_specs += [resident(min2d), resident(max2d)]
    inputs += [min2d, max2d]

    out_specs = pl.BlockSpec((tm, out_padded), lambda i: (i, 0))

    # Advisory cost estimate (unpadded batch) for the XLA scheduler.
    flops = 2 * B * sum(int(w.shape[0]) * int(w.shape[1]) for w, _ in layers)
    transcendentals = B * (sum(int(w.shape[1]) for w, _ in enc) + out_padded)
    bytes_accessed = int(B * D * x.dtype.itemsize
                         + B * out_padded * jnp.dtype(out_dtype).itemsize
                         + resident_bytes)

    out = pl.pallas_call(
        _make_ae_kernel(n_enc, n_layers),
        out_shape=jax.ShapeDtypeStruct((bp, out_padded), out_dtype),
        grid=grid,
        in_specs=in_specs,
        out_specs=out_specs,
        compiler_params=pltpu.CompilerParams(
            dimension_semantics=("parallel",),
            vmem_limit_bytes=vmem_limit),
        cost_estimate=pl.CostEstimate(
            flops=flops,
            transcendentals=transcendentals,
            bytes_accessed=bytes_accessed),
    )(*inputs)

    if pad or out_pad:
        out = out[:B, :out_dim]
    return out


def init_ae_params(key, input_dim, compress_dims=(16,), decompress_dims=(16,)):
    """PyTorch-Linear-style init U(-1/sqrt(fan_in), 1/sqrt(fan_in)).

    Weights stored (in, out) and biases (1, out), both f32 (weights are
    VMEM-resident, so bf16 would buy nothing and cost precision).
    """
    def make_layers(key, dims_in_out):
        layers = []
        for fan_in, fan_out in dims_in_out:
            key, kw, kb = jax.random.split(key, 3)
            bound = 1.0 / float(fan_in) ** 0.5
            w = jax.random.uniform(kw, (fan_in, fan_out), jnp.float32, -bound, bound)
            b = jax.random.uniform(kb, (1, fan_out), jnp.float32, -bound, bound)
            layers.append((w, b))
        return key, layers

    enc_dims, d = [], input_dim
    for c in compress_dims:
        enc_dims.append((d, c))
        d = c
    dec_dims = []
    for c in decompress_dims:
        dec_dims.append((d, c))
        d = c

    key, enc = make_layers(key, enc_dims)
    key, dec = make_layers(key, dec_dims)
    return {"encoder": enc, "decoder": dec}


def ae_reference(x, params, mindata, maxdata):
    """Pure-JAX f32 reference (HIGHEST precision matmuls) for correctness."""
    hi = jax.lax.Precision.HIGHEST
    enc = list(params["encoder"])
    dec = list(params["decoder"])
    h = x.astype(jnp.float32)
    for w, b in enc:
        h = jnp.tanh(jnp.dot(h, w.astype(jnp.float32), precision=hi) + b)
    for w, b in dec[:-1]:
        h = jnp.dot(h, w.astype(jnp.float32), precision=hi) + b
    w, b = dec[-1]
    h = jax.nn.sigmoid(jnp.dot(h, w.astype(jnp.float32), precision=hi) + b)
    min_ = jnp.asarray(mindata, jnp.float32).reshape(1, -1)
    max_ = jnp.asarray(maxdata, jnp.float32).reshape(1, -1)
    return min_ + (max_ - min_) * h


if __name__ == "__main__":
    key = jax.random.PRNGKey(0)
    key, kx, kp = jax.random.split(key, 3)

    batch = 512                    # exercises a 4-step parallel batch grid
    input_dim = 64
    compress_dims = (32, 16)       # encoder: 64->32 (tanh) -> 16 (tanh)
    decompress_dims = (32, 64)     # decoder: 16->32 (linear) -> 64 (sigmoid)

    x = jax.random.uniform(kx, (batch, input_dim), jnp.float32)
    params = init_ae_params(kp, input_dim, compress_dims, decompress_dims)
    mindata = jnp.linspace(-1.0, 0.0, input_dim, dtype=jnp.float32)
    maxdata = jnp.linspace(1.0, 2.0, input_dim, dtype=jnp.float32)

    y = ae_forward(x, params, mindata, maxdata)
    y = jax.block_until_ready(y)

    y_ref = ae_reference(x, params, mindata, maxdata)
    assert y.shape == (batch, input_dim), y.shape
    # f32 weights + f32 accumulation -> tight tolerance (was 2e-2 with bf16 weights).
    assert jnp.allclose(y, y_ref, atol=1e-3, rtol=1e-3), (
        float(jnp.max(jnp.abs(y - y_ref))))

    print("KERNEL_OK")
</pallas_src>

<mosaic_0001>
module attributes {stable_mosaic.version = 11 : i64} {
  func.func @kernel(%arg0: i32, %arg1: memref<128x64xf32, #tpu.memory_space<vmem>>, %arg2: memref<64x32xf32, #tpu.memory_space<vmem>>, %arg3: memref<1x32xf32, #tpu.memory_space<vmem>>, %arg4: memref<32x16xf32, #tpu.memory_space<vmem>>, %arg5: memref<1x16xf32, #tpu.memory_space<vmem>>, %arg6: memref<16x32xf32, #tpu.memory_space<vmem>>, %arg7: memref<1x32xf32, #tpu.memory_space<vmem>>, %arg8: memref<32x128xf32, #tpu.memory_space<vmem>>, %arg9: memref<1x128xf32, #tpu.memory_space<vmem>>, %arg10: memref<1x128xf32, #tpu.memory_space<vmem>>, %arg11: memref<1x128xf32, #tpu.memory_space<vmem>>, %arg12: memref<128x128xf32, #tpu.memory_space<vmem>>) attributes {dimension_semantics = [#tpu.dimension_semantics<parallel>], iteration_bounds = array<i64: 4>, scalar_prefetch = 0 : i64, scratch_operands = 0 : i64, tpu.core_type = #tpu.core_type<tc>, window_params = [{transform_indices = @transform_0, window_bounds = array<i64: 128, 64>}, {pipeline_mode = #tpu.pipeline_mode<synchronous>, transform_indices = @transform_1, window_bounds = array<i64: 64, 32>}, {pipeline_mode = #tpu.pipeline_mode<synchronous>, transform_indices = @transform_2, window_bounds = array<i64: 1, 32>}, {pipeline_mode = #tpu.pipeline_mode<synchronous>, transform_indices = @transform_3, window_bounds = array<i64: 32, 16>}, {pipeline_mode = #tpu.pipeline_mode<synchronous>, transform_indices = @transform_4, window_bounds = array<i64: 1, 16>}, {pipeline_mode = #tpu.pipeline_mode<synchronous>, transform_indices = @transform_5, window_bounds = array<i64: 16, 32>}, {pipeline_mode = #tpu.pipeline_mode<synchronous>, transform_indices = @transform_6, window_bounds = array<i64: 1, 32>}, {pipeline_mode = #tpu.pipeline_mode<synchronous>, transform_indices = @transform_7, window_bounds = array<i64: 32, 128>}, {pipeline_mode = #tpu.pipeline_mode<synchronous>, transform_indices = @transform_8, window_bounds = array<i64: 1, 128>}, {pipeline_mode = #tpu.pipeline_mode<synchronous>, transform_indices = @transform_9, window_bounds = array<i64: 1, 128>}, {pipeline_mode = #tpu.pipeline_mode<synchronous>, transform_indices = @transform_10, window_bounds = array<i64: 1, 128>}, {transform_indices = @transform_11, window_bounds = array<i64: 128, 128>}]} {
    %c0 = arith.constant 0 : index
    %c0_0 = arith.constant 0 : index
    %0 = vector.load %arg1[%c0, %c0_0] : memref<128x64xf32, #tpu.memory_space<vmem>>, vector<128x64xf32>
    %c0_1 = arith.constant 0 : index
    %c0_2 = arith.constant 0 : index
    %1 = vector.load %arg2[%c0_1, %c0_2] : memref<64x32xf32, #tpu.memory_space<vmem>>, vector<64x32xf32>
    %c0_3 = arith.constant 0 : index
    %c0_4 = arith.constant 0 : index
    %2 = vector.load %arg3[%c0_3, %c0_4] : memref<1x32xf32, #tpu.memory_space<vmem>>, vector<1x32xf32>
    %cst = arith.constant dense<0.000000e+00> : vector<128x32xf32>
    %3 = tpu.matmul %0, %1, %cst {dimension_numbers = #tpu.dot_dimension_numbers<[1], [0], [0], [1], [0, 0, 1, 1], [], []>} : vector<128x64xf32>, vector<64x32xf32>, vector<128x32xf32> -> vector<128x32xf32>
    %4 = vector.broadcast %2 : vector<1x32xf32> to vector<128x32xf32>
    %5 = arith.addf %3, %4 : vector<128x32xf32>
    %6 = math.tanh %5 : vector<128x32xf32>
    %c0_5 = arith.constant 0 : index
    %c0_6 = arith.constant 0 : index
    %7 = vector.load %arg4[%c0_5, %c0_6] : memref<32x16xf32, #tpu.memory_space<vmem>>, vector<32x16xf32>
    %c0_7 = arith.constant 0 : index
    %c0_8 = arith.constant 0 : index
    %8 = vector.load %arg5[%c0_7, %c0_8] : memref<1x16xf32, #tpu.memory_space<vmem>>, vector<1x16xf32>
    %cst_9 = arith.constant dense<0.000000e+00> : vector<128x16xf32>
    %9 = tpu.matmul %6, %7, %cst_9 {dimension_numbers = #tpu.dot_dimension_numbers<[1], [0], [0], [1], [0, 0, 1, 1], [], []>} : vector<128x32xf32>, vector<32x16xf32>, vector<128x16xf32> -> vector<128x16xf32>
    %10 = vector.broadcast %8 : vector<1x16xf32> to vector<128x16xf32>
    %11 = arith.addf %9, %10 : vector<128x16xf32>
    %12 = math.tanh %11 : vector<128x16xf32>
    %c0_10 = arith.constant 0 : index
    %c0_11 = arith.constant 0 : index
    %13 = vector.load %arg6[%c0_10, %c0_11] : memref<16x32xf32, #tpu.memory_space<vmem>>, vector<16x32xf32>
    %c0_12 = arith.constant 0 : index
    %c0_13 = arith.constant 0 : index
    %14 = vector.load %arg7[%c0_12, %c0_13] : memref<1x32xf32, #tpu.memory_space<vmem>>, vector<1x32xf32>
    %cst_14 = arith.constant dense<0.000000e+00> : vector<128x32xf32>
    %15 = tpu.matmul %12, %13, %cst_14 {dimension_numbers = #tpu.dot_dimension_numbers<[1], [0], [0], [1], [0, 0, 1, 1], [], []>} : vector<128x16xf32>, vector<16x32xf32>, vector<128x32xf32> -> vector<128x32xf32>
    %16 = vector.broadcast %14 : vector<1x32xf32> to vector<128x32xf32>
    %17 = arith.addf %15, %16 : vector<128x32xf32>
    %c0_15 = arith.constant 0 : index
    %c0_16 = arith.constant 0 : index
    %18 = vector.load %arg8[%c0_15, %c0_16] : memref<32x128xf32, #tpu.memory_space<vmem>>, vector<32x128xf32>
    %c0_17 = arith.constant 0 : index
    %c0_18 = arith.constant 0 : index
    %19 = vector.load %arg9[%c0_17, %c0_18] : memref<1x128xf32, #tpu.memory_space<vmem>>, vector<1x128xf32>
    %cst_19 = arith.constant dense<0.000000e+00> : vector<128x128xf32>
    %20 = tpu.matmul %17, %18, %cst_19 {dimension_numbers = #tpu.dot_dimension_numbers<[1], [0], [0], [1], [0, 0, 1, 1], [], []>} : vector<128x32xf32>, vector<32x128xf32>, vector<128x128xf32> -> vector<128x128xf32>
    %21 = vector.broadcast %19 : vector<1x128xf32> to vector<128x128xf32>
    %22 = arith.addf %20, %21 : vector<128x128xf32>
    %23 = arith.negf %22 : vector<128x128xf32>
    %24 = math.exp %23 : vector<128x128xf32>
    %cst_20 = arith.constant 1.000000e+00 : f32
    %25 = vector.broadcast %cst_20 : f32 to vector<128x128xf32>
    %26 = arith.addf %25, %24 : vector<128x128xf32>
    %27 = arith.divf %25, %26 : vector<128x128xf32>
    %c0_21 = arith.constant 0 : index
    %c0_22 = arith.constant 0 : index
    %28 = vector.load %arg10[%c0_21, %c0_22] : memref<1x128xf32, #tpu.memory_space<vmem>>, vector<1x128xf32>
    %c0_23 = arith.constant 0 : index
    %c0_24 = arith.constant 0 : index
    %29 = vector.load %arg11[%c0_23, %c0_24] : memref<1x128xf32, #tpu.memory_space<vmem>>, vector<1x128xf32>
    %c0_25 = arith.constant 0 : index
    %c0_26 = arith.constant 0 : index
    %30 = vector.load %arg10[%c0_25, %c0_26] : memref<1x128xf32, #tpu.memory_space<vmem>>, vector<1x128xf32>
    %31 = arith.subf %29, %30 : vector<1x128xf32>
    %32 = vector.broadcast %31 : vector<1x128xf32> to vector<128x128xf32>
    %33 = arith.mulf %32, %27 : vector<128x128xf32>
    %34 = vector.broadcast %28 : vector<1x128xf32> to vector<128x128xf32>
    %35 = arith.addf %34, %33 : vector<128x128xf32>
    %c0_27 = arith.constant 0 : index
    %c0_28 = arith.constant 0 : index
    %36 = vector.load %arg12[%c0_27, %c0_28] : memref<128x128xf32, #tpu.memory_space<vmem>>, vector<128x128xf32>
    tpu.vector_store %arg12[%c0_27, %c0_28], %35 {strides = array<i32>} : memref<128x128xf32, #tpu.memory_space<vmem>>, vector<128x128xf32>,
    return
  }
  func.func @transform_0(%arg0: i32) -> (i32, i32) {
    %c0_i32 = arith.constant 0 : i32
    %c0_i32_0 = arith.constant 0 : i32
    return %arg0, %c0_i32 : i32, i32
  }
  func.func @transform_1(%arg0: i32) -> (i32, i32) {
    %c0_i32 = arith.constant 0 : i32
    %c0_i32_0 = arith.constant 0 : i32
    %c0_i32_1 = arith.constant 0 : i32
    return %c0_i32, %c0_i32_0 : i32, i32
  }
  func.func @transform_2(%arg0: i32) -> (i32, i32) {
    %c0_i32 = arith.constant 0 : i32
    %c0_i32_0 = arith.constant 0 : i32
    %c0_i32_1 = arith.constant 0 : i32
    return %c0_i32, %c0_i32_0 : i32, i32
  }
  func.func @transform_3(%arg0: i32) -> (i32, i32) {
    %c0_i32 = arith.constant 0 : i32
    %c0_i32_0 = arith.constant 0 : i32
    %c0_i32_1 = arith.constant 0 : i32
    return %c0_i32, %c0_i32_0 : i32, i32
  }
  func.func @transform_4(%arg0: i32) -> (i32, i32) {
    %c0_i32 = arith.constant 0 : i32
    %c0_i32_0 = arith.constant 0 : i32
    %c0_i32_1 = arith.constant 0 : i32
    return %c0_i32, %c0_i32_0 : i32, i32
  }
  func.func @transform_5(%arg0: i32) -> (i32, i32) {
    %c0_i32 = arith.constant 0 : i32
    %c0_i32_0 = arith.constant 0 : i32
    %c0_i32_1 = arith.constant 0 : i32
    return %c0_i32, %c0_i32_0 : i32, i32
  }
  func.func @transform_6(%arg0: i32) -> (i32, i32) {
    %c0_i32 = arith.constant 0 : i32
    %c0_i32_0 = arith.constant 0 : i32
    %c0_i32_1 = arith.constant 0 : i32
    return %c0_i32, %c0_i32_0 : i32, i32
  }
  func.func @transform_7(%arg0: i32) -> (i32, i32) {
    %c0_i32 = arith.constant 0 : i32
    %c0_i32_0 = arith.constant 0 : i32
    %c0_i32_1 = arith.constant 0 : i32
    return %c0_i32, %c0_i32_0 : i32, i32
  }
  func.func @transform_8(%arg0: i32) -> (i32, i32) {
    %c0_i32 = arith.constant 0 : i32
    %c0_i32_0 = arith.constant 0 : i32
    %c0_i32_1 = arith.constant 0 : i32
    return %c0_i32, %c0_i32_0 : i32, i32
  }
  func.func @transform_9(%arg0: i32) -> (i32, i32) {
    %c0_i32 = arith.constant 0 : i32
    %c0_i32_0 = arith.constant 0 : i32
    %c0_i32_1 = arith.constant 0 : i32
    return %c0_i32, %c0_i32_0 : i32, i32
  }
  func.func @transform_10(%arg0: i32) -> (i32, i32) {
    %c0_i32 = arith.constant 0 : i32
    %c0_i32_0 = arith.constant 0 : i32
    %c0_i32_1 = arith.constant 0 : i32
    return %c0_i32, %c0_i32_0 : i32, i32
  }
  func.func @transform_11(%arg0: i32) -> (i32, i32) {
    %c0_i32 = arith.constant 0 : i32
    %c0_i32_0 = arith.constant 0 : i32
    return %arg0, %c0_i32 : i32, i32
  }
}

</mosaic_0001>

<bundles_post_ra>
// kernel: tpu_custom_call.1
= control target key start
LH: loop header
LB: loop body
LE: loop exit
PB: predicated region body
PF: predicated region fallthrough
CT: control target
= control target key end

     0   :  { %16 = vsyncpa [#allocation3], 0  ;;  %s2111_s0 = inlined_call_operand.vmem [shape: f32[512,64], index: 0, kind: input, shape index: {}]   ;;  %s2112_s1 = inlined_call_operand.vmem [shape: f32[64,32], index: 1, kind: input, shape index: {}]   ;;  %s2113_s2 = inlined_call_operand.vmem [shape: f32[1,32], index: 2, kind: input, shape index: {}]   ;;  %s2114_s3 = inlined_call_operand.vmem [shape: f32[32,16], index: 3, kind: input, shape index: {}]   ;;  %s2115_s4 = inlined_call_operand.vmem [shape: f32[1,16], index: 4, kind: input, shape index: {}]   ;;  %s2116_s5 = inlined_call_operand.vmem [shape: f32[16,32], index: 5, kind: input, shape index: {}]   ;;  %s2117_s6 = inlined_call_operand.vmem [shape: f32[1,32], index: 6, kind: input, shape index: {}]   ;;  %s2118_s7 = inlined_call_operand.vmem [shape: f32[32,128], index: 7, kind: input, shape index: {}]   ;;  %s2119_s8 = inlined_call_operand.vmem [shape: f32[1,128], index: 8, kind: input, shape index: {}]   ;;  %s2120_s9 = inlined_call_operand.vmem [shape: f32[1,128], index: 9, kind: input, shape index: {}]   ;;  %s2121_s10 = inlined_call_operand.vmem [shape: f32[1,128], index: 10, kind: input, shape index: {}]   ;;  %s2122_s11 = inlined_call_operand.hbm [shape: f32[512,128], index: 11, kind: output, shape index: {}]  }
   0x1   :  { %18 = vsyncpa [#allocation3 + $0x1], 0  ;;  %s1757_s17 = smov 0   ;;  %s1759_s18 = smov 0  }
   0x2   :  { %s1761_s19 = smov 0   ;;  %s1763_s20 = smov 0  }
   0x3 LB: > { %2124 = sst [smem:[#allocation5_spill]] %s1689_s19  ;;  %s1778_s21 = sadd.s32 4294967295, %s1693_s20   ;;  %s1693_s20 = sphi %s1763_s20, %s2132_s20   ;;  %s1689_s19 = sphi %s1761_s19, %s2129_s19   ;;  %s1685_s18 = sphi %s1759_s18, %s2131_s18   ;;  %s1681_s17 = sphi %s1757_s17, %s2130_s17  }
   0x4   : > { %s1364_s22 = sadd.s32 4294967294, %s1693_s20   ;;  %s1782_s23 = sadd.s32 1, %s1693_s20  }
   0x5   : > { %s267_s24 = sadd.s32 1, %s1689_s19  ;;  %s264_s25 = ssub.s32 %s1693_s20, %s1782_s23 }
   0x6   : > { %p277_p0 = scmp.ne.s32.totalorder %s1689_s19, %s1685_s18  ;;  %p265_p1 = scmp.eq.s32.totalorder %s264_s25, 0 }
   0x7   : > { %p278_p2 = scmp.eq.s32.totalorder %s1778_s21, 3  ;;  %p283_p3 = scmp.ne.s32.totalorder %s1685_s18, %s1681_s17 }
   0x8   : > { %p284_p4 = scmp.eq.s32.totalorder %s1364_s22, 3  ;;  %p1367_p7 = scmp.ge.s32.totalorder %s1693_s20, 1 }
   0x9   : > { %s1793_s26 = scalar_select %p265_p1, %s1689_s19, %s267_s24  }
   0xa   : > { %p1795_p5 = por %p278_p2, %p277_p0  ;;  %p1799_p6 = por %p284_p4, %p283_p3 }
   0xb   : > { %2125 = sst [smem:[#allocation6_spill]] %s1793_s26  ;;  %p341_p8 = scmp.lt.s32.totalorder %s1693_s20, 5 }
   0xd   : > { %p342_p9 = pnand %p1367_p7, %p341_p8 }
   0xe   : > { %s1369_s14 = sshll.u32 (!%p342_p9), %s1778_s21, 4  ;;  %s378_s16 = sand.u32 (!%p342_p9), 1, %s1685_s18  }
   0xf   : > { %345 = sbr.rel (%p342_p9) target bundleno = 730 (0x2da), region = 64  ;;  %p382_p10 = scmp.lt.s32.totalorder (!%p342_p9), %s1369_s14, 63 }
  0x10   : > { %s1456_s26 = sshll.u32 (!%p342_p9), %s1778_s21, 7  ;;  %s1287_s13 = scalar_lea.sflag (!%p342_p9), [#allocation3], %s378_s16 }
  0x14   : > { %v411_v0 = vld [vmem:[%s2112_s1 + $0x38] sm:$0xff]  ;;  %v410_v1 = vld [vmem:[%s2112_s1 + $0x30] sm:$0xff]  ;;  %v409_v2 = vld [vmem:[%s2112_s1 + $0x28] sm:$0xff]  ;;  %s2134_s14 = smov (!%p382_p10, %s1369_s14), 63  ;;  %vm416_vm0 = vcmask 523264   ;;  %vm554_vm1 = vcmask 261120  }
  0x15   : > { %473 = vmatpush.msra.mxu0 %v411_v0  ;;  %v408_v3 = vld [vmem:[%s2112_s1 + $0x20] sm:$0xff]  ;;  %v407_v4 = vld [vmem:[%s2112_s1 + $0x18] sm:$0xff]  ;;  %s1370_s30 = sshll.u32 %s2134_s14, 3  ;;  %v406_v5 = vld [vmem:[%s2112_s1 + $0x10] sm:$0xff]  ;;  %vm690_vm2 = vcmask 130048   ;;  %s1368_s14 = sshll.u32 %s378_s16, 7 }
  0x16   : > { %v405_v6 = vld [vmem:[%s2112_s1 + $0x8] sm:$0xff]  ;;  %s1830_s22 = scalar_lea.vmem %s2111_s0, %s1370_s30  ;;  %v404_v7 = vld [vmem:[%s2112_s1] sm:$0xff]  ;;  %v549_v21 = vld [vmem:[%s2114_s3 + $0x18] sm:$0xff]  ;;  %s2018_s19 = scalar_lea.vmem [#allocation2], %s1368_s14 }
  0x17   : > { %474 = vmatpush.msra.mxu0 %v410_v1  ;;  %v388_v8 = vld [vmem:[%s1830_s22] sm:$0xff]  ;;  %v389_v9 = vld [vmem:[%s1830_s22 + $0x8] sm:$0xff]  ;;  %v390_v10 = vld [vmem:[%s1830_s22 + $0x10] sm:$0xff]  ;;  %615 = vmatpush.msra.mxu1 %v549_v21  ;;  %s1298_s30 = scalar_lea.hbm %s2122_s11, %s1456_s26  ;;  %s1299_s21 = sshll.u32 %s2018_s19, 4  ;;  %s1300_s21 = int_to_ptr.vmem [resolvable:$true] %s1299_s21 }
  0x18   : > { %v391_v11 = vld [vmem:[%s1830_s22 + $0x18] sm:$0xff]  ;;  %v392_v12 = vld [vmem:[%s1830_s22 + $0x20] sm:$0xff]  ;;  %v393_v13 = vld [vmem:[%s1830_s22 + $0x28] sm:$0xff]  ;;  %s1301_s12 = sshll.u32 %s1298_s30, 4  ;;  %s1651_s26 = scalar_lea.hbm %s2122_s11, 512  ;;  %s1302_s12 = int_to_ptr.hbm [resolvable:$true] %s1301_s12 }
  0x19   : > { %475 = vmatpush.msra.mxu0 %v409_v2  ;;  %v394_v14 = vld [vmem:[%s1830_s22 + $0x30] sm:$0xff]  ;;  %v395_v15 = vld [vmem:[%s1830_s22 + $0x38] sm:$0xff]  ;;  %v396_v16 = vld [vmem:[%s1830_s22 + $0x40] sm:$0xff]  ;;  %s1645_s15 = sshra.s32 %s1302_s12, 4  ;;  %s1646_s15 = int_to_ptr.hbm [resolvable:$true] %s1645_s15 }
  0x1a   : > { %v397_v17 = vld [vmem:[%s1830_s22 + $0x48] sm:$0xff]  ;;  %v398_v18 = vld [vmem:[%s1830_s22 + $0x50] sm:$0xff]  ;;  %v399_v19 = vld [vmem:[%s1830_s22 + $0x58] sm:$0xff]  ;;  %s1647_s14 = scalar_lea.hbm %s1646_s15, 128  ;;  %p1652_p0 = scmp.lt.s32.totalorder %s1646_s15, %s2122_s11 }
  0x1b   : > { %476 = vmatpush.msra.mxu0 %v408_v3  ;;  %v400_v20 = vld [vmem:[%s1830_s22 + $0x60] sm:$0xff]  ;;  %v548_v22 = vld [vmem:[%s2114_s3 + $0x10] sm:$0xff]  ;;  %v547_v23 = vld [vmem:[%s2114_s3 + $0x8] sm:$0xff]  ;;  %p1648_p11 = scmp.ne.s32.totalorder %s1646_s15, %s1647_s14  ;;  %p1653_p1 = scmp.lt.s32.totalorder %s1651_s26, %s1647_s14 }
  0x1c   : > { %616 = vmatpush.msra.mxu1 %v548_v22  ;;  %v401_v24 = vld [vmem:[%s1830_s22 + $0x68] sm:$0xff]  ;;  %v546_v25 = vld [vmem:[%s2114_s3] sm:$0xff]  ;;  %v402_v26 = vld [vmem:[%s1830_s22 + $0x70] sm:$0xff] }
  0x1d   : > { %477 = vmatpush.msra.mxu0 %v407_v4  ;;  %v403_v27 = vld [vmem:[%s1830_s22 + $0x78] sm:$0xff]  ;;  %v1882_v28 = vld [vmem:[%s2113_s2] ss:$0 sm:$0xff]  ;;  %p1649_p12 = pnand %p1648_p11, %p1795_p5  ;;  %p1654_p2 = por %p1653_p1, %p1652_p0 }
  0x1e   : > { %617 = vmatpush.msra.mxu1 %v547_v23 }
  0x1f   : > { %478 = vmatpush.msra.mxu0 %v406_v5  ;;  %p1650_p13 = pneg %p1649_p12 }
  0x20   : > { %618 = vmatpush.msra.mxu1 %v546_v25 }
  0x21   : > { %479 = vmatpush.msra.mxu0 %v405_v6  ;;  %v685_v6 = vld [vmem:[%s2116_s5 + $0x8] sm:$0xff]  ;;  %p1655_p3 = pnand %p1654_p2, %p1650_p13 }
  0x22   : > { %753 = vmatpush.msra.mxu2 %v685_v6 }
  0x23   : > { %480 = vmatpush.msra.mxu0 %v404_v7  ;;  %v684_v7 = vld [vmem:[%s2116_s5] sm:$0xff] }
  0x24   : > { %1371 = vmatmul.msk.f32.vlgmr.msra.gmra.mxu0 %vm416_vm0, %v388_v8  ;;  %754 = vmatpush.msra.mxu2 %v684_v7 }
  0x2c   : > { %1372 = vmatmul.msk.f32.gmra.mxu0 %vm416_vm0, %v389_v9 }
  0x34   : > { %1373 = vmatmul.msk.f32.gmra.mxu0 %vm416_vm0, %v390_v10 }
  0x3c   : > { %1374 = vmatmul.msk.f32.gmra.mxu0 %vm416_vm0, %v391_v11 }
  0x44   : > { %1375 = vmatmul.msk.f32.gmra.mxu0 %vm416_vm0, %v392_v12 }
  0x4c   : > { %1376 = vmatmul.msk.f32.gmra.mxu0 %vm416_vm0, %v393_v13 }
  0x54   : > { %1377 = vmatmul.msk.f32.gmra.mxu0 %vm416_vm0, %v394_v14 }
  0x5c   : > { %1378 = vmatmul.msk.f32.gmra.mxu0 %vm416_vm0, %v395_v15  ;;  %v1925_v15 = vld [vmem:[%s2115_s4] ss:$0 sm:$0xff] }
  0x64   : > { %1379 = vmatmul.msk.f32.gmra.mxu0 %vm416_vm0, %v396_v16 }
  0x6c   : > { %1380 = vmatmul.msk.f32.gmra.mxu0 %vm416_vm0, %v397_v17 }
  0x74   : > { %1381 = vmatmul.msk.f32.gmra.mxu0 %vm416_vm0, %v398_v18 }
  0x7c   : > { %1382 = vmatmul.msk.f32.gmra.mxu0 %vm416_vm0, %v399_v19 }
  0x84   : > { %1383 = vmatmul.msk.f32.gmra.mxu0 %vm416_vm0, %v400_v20 }
  0x8c   : > { %1384 = vmatmul.msk.f32.gmra.mxu0 %vm416_vm0, %v401_v24 }
  0x94   : > { %1385 = vmatmul.msk.f32.gmra.mxu0 %vm416_vm0, %v402_v26 }
  0x9c   : > { %1386 = vmatmul.msk.f32.gmra.mxu0 %vm416_vm0, %v403_v27 }
  0xa1   : > { %v482_v29 = vpop.f32.mrf.mxu0 }
  0xa2   : > { %v483_v30 = vadd.f32 %v1882_v28, %v482_v29 }
  0xa4   : > { %1503 = vtanh.f32 %v483_v30 }
  0xa9   : > { %v485_v31 = vpop.f32.mrf.mxu0 }
  0xaa   : > { %v1504_v32 = vpop.eup %1503  ;;  %v486_v33 = vadd.f32 %v1882_v28, %v485_v31 }
  0xab   : > { %1387 = vmatmul.msk.f32.vlgmr.msra.gmra.mxu1 %vm554_vm1, %v1504_v32 }
  0xac   : > { %1505 = vtanh.f32 %v486_v33 }
  0xb1   : > { %v488_v34 = vpop.f32.mrf.mxu0 }
  0xb2   : > { %v1506_v35 = vpop.eup %1505  ;;  %v489_v36 = vadd.f32 %v1882_v28, %v488_v34 }
  0xb3   : > { %1388 = vmatmul.msk.f32.gmra.mxu1 %vm554_vm1, %v1506_v35 }
  0xb4   : > { %1507 = vtanh.f32 %v489_v36 }
  0xb9   : > { %v491_v37 = vpop.f32.mrf.mxu0 }
  0xba   : > { %v1508_v38 = vpop.eup %1507  ;;  %v492_v39 = vadd.f32 %v1882_v28, %v491_v37 }
  0xbb   : > { %1389 = vmatmul.msk.f32.gmra.mxu1 %vm554_vm1, %v1508_v38 }
  0xbc   : > { %1509 = vtanh.f32 %v492_v39 }
  0xc1   : > { %v494_v40 = vpop.f32.mrf.mxu0 }
  0xc2   : > { %v1510_v41 = vpop.eup %1509  ;;  %v495_v42 = vadd.f32 %v1882_v28, %v494_v40 }
  0xc3   : > { %1390 = vmatmul.msk.f32.gmra.mxu1 %vm554_vm1, %v1510_v41 }
  0xc4   : > { %1511 = vtanh.f32 %v495_v42 }
  0xc9   : > { %v497_v43 = vpop.f32.mrf.mxu0 }
  0xca   : > { %v1512_v44 = vpop.eup %1511  ;;  %v498_v45 = vadd.f32 %v1882_v28, %v497_v43 }
  0xcb   : > { %1391 = vmatmul.msk.f32.gmra.mxu1 %vm554_vm1, %v1512_v44 }
  0xcc   : > { %1513 = vtanh.f32 %v498_v45 }
  0xd1   : > { %v500_v46 = vpop.f32.mrf.mxu0 }
  0xd2   : > { %v1514_v47 = vpop.eup %1513  ;;  %v501_v48 = vadd.f32 %v1882_v28, %v500_v46 }
  0xd3   : > { %1392 = vmatmul.msk.f32.gmra.mxu1 %vm554_vm1, %v1514_v47 }
  0xd4   : > { %1515 = vtanh.f32 %v501_v48 }
  0xd9   : > { %v503_v49 = vpop.f32.mrf.mxu0 }
  0xda   : > { %v1516_v50 = vpop.eup %1515  ;;  %v504_v51 = vadd.f32 %v1882_v28, %v503_v49 }
  0xdb   : > { %1393 = vmatmul.msk.f32.gmra.mxu1 %vm554_vm1, %v1516_v50 }
  0xdc   : > { %1517 = vtanh.f32 %v504_v51 }
  0xe1   : > { %v506_v52 = vpop.f32.mrf.mxu0 }
  0xe2   : > { %v1518_v53 = vpop.eup %1517  ;;  %v507_v54 = vadd.f32 %v1882_v28, %v506_v52 }
  0xe3   : > { %1394 = vmatmul.msk.f32.gmra.mxu1 %vm554_vm1, %v1518_v53 }
  0xe4   : > { %1519 = vtanh.f32 %v507_v54  ;;  %v807_v54 = vld [vmem:[%s2118_s7 + $0x18] sm:$0xff] }
  0xe5   : > { %872 = vmatpush.msra.mxu3 %v807_v54 }
  0xe9   : > { %v509_v55 = vpop.f32.mrf.mxu0 }
  0xea   : > { %v1520_v56 = vpop.eup %1519  ;;  %v510_v57 = vadd.f32 %v1882_v28, %v509_v55  ;;  %v806_v55 = vld [vmem:[%s2118_s7 + $0x10] sm:$0xff] }
  0xeb   : > { %1395 = vmatmul.msk.f32.gmra.mxu1 %vm554_vm1, %v1520_v56  ;;  %873 = vmatpush.msra.mxu3 %v806_v55 }
  0xec   : > { %1521 = vtanh.f32 %v510_v57 }
  0xf1   : > { %v512_v58 = vpop.f32.mrf.mxu0 }
  0xf2   : > { %v1522_v59 = vpop.eup %1521  ;;  %v513_v60 = vadd.f32 %v1882_v28, %v512_v58 }
  0xf3   : > { %1396 = vmatmul.msk.f32.gmra.mxu1 %vm554_vm1, %v1522_v59  ;;  %v805_v59 = vld [vmem:[%s2118_s7 + $0x8] sm:$0xff] }
  0xf4   : > { %1523 = vtanh.f32 %v513_v60  ;;  %874 = vmatpush.msra.mxu3 %v805_v59  ;;  %v804_v60 = vld [vmem:[%s2118_s7] sm:$0xff] }
  0xf6   : > { %875 = vmatpush.msra.mxu3 %v804_v60 }
  0xf9   : > { %v515_v61 = vpop.f32.mrf.mxu0 }
  0xfa   : > { %v1524_v62 = vpop.eup %1523  ;;  %v516_v63 = vadd.f32 %v1882_v28, %v515_v61 }
  0xfb   : > { %1397 = vmatmul.msk.f32.gmra.mxu1 %vm554_vm1, %v1524_v62 }
  0xfc   : > { %1525 = vtanh.f32 %v516_v63 }
 0x101   : > { %v518_v0 = vpop.f32.mrf.mxu0 }
 0x102   : > { %v1526_v1 = vpop.eup %1525  ;;  %v519_v2 = vadd.f32 %v1882_v28, %v518_v0 }
 0x103   : > { %1398 = vmatmul.msk.f32.gmra.mxu1 %vm554_vm1, %v1526_v1 }
 0x104   : > { %1527 = vtanh.f32 %v519_v2 }
 0x109   : > { %v521_v3 = vpop.f32.mrf.mxu0 }
 0x10a   : > { %v1528_v4 = vpop.eup %1527  ;;  %v522_v5 = vadd.f32 %v1882_v28, %v521_v3 }
 0x10b   : > { %1399 = vmatmul.msk.f32.gmra.mxu1 %vm554_vm1, %v1528_v4  ;;  %v1500_v4 = vld [vmem:[%s2117_s6] ss:$0 sm:$0xff] }
 0x10c   : > { %1529 = vtanh.f32 %v522_v5 }
 0x111   : > { %v524_v8 = vpop.f32.mrf.mxu0 }
 0x112   : > { %v1530_v9 = vpop.eup %1529  ;;  %v525_v10 = vadd.f32 %v1882_v28, %v524_v8 }
 0x113   : > { %1400 = vmatmul.msk.f32.gmra.mxu1 %vm554_vm1, %v1530_v9 }
 0x114   : > { %1531 = vtanh.f32 %v525_v10 }
 0x119   : > { %v527_v11 = vpop.f32.mrf.mxu0 }
 0x11a   : > { %v1532_v12 = vpop.eup %1531  ;;  %v528_v13 = vadd.f32 %v1882_v28, %v527_v11 }
 0x11b   : > { %1401 = vmatmul.msk.f32.gmra.mxu1 %vm554_vm1, %v1532_v12 }
 0x11c   : > { %1533 = vtanh.f32 %v528_v13 }
 0x122   : > { %v1534_v14 = vpop.eup %1533 }
 0x123   : > { %1402 = vmatmul.msk.f32.gmra.mxu1 %vm554_vm1, %v1534_v14 }
 0x128   : > { %v620_v16 = vpop.f32.mrf.mxu1 }
 0x129   : > { %v621_v17 = vadd.f32 %v1925_v15, %v620_v16 }
 0x12b   : > { %1535 = vtanh.f32 %v621_v17 }
 0x130   : > { %v623_v18 = vpop.f32.mrf.mxu1 }
 0x131   : > { %v1536_v19 = vpop.eup %1535  ;;  %v624_v20 = vadd.f32 %v1925_v15, %v623_v18 }
 0x132   : > { %1403 = vmatmul.msk.f32.vlgmr.msra.gmra.mxu2 %vm690_vm2, %v1536_v19 }
 0x133   : > { %1537 = vtanh.f32 %v624_v20 }
 0x138   : > { %v626_v21 = vpop.f32.mrf.mxu1 }
 0x139   : > { %v1538_v22 = vpop.eup %1537  ;;  %v627_v23 = vadd.f32 %v1925_v15, %v626_v21 }
 0x13a   : > { %1404 = vmatmul.msk.f32.gmra.mxu2 %vm690_vm2, %v1538_v22 }
 0x13b   : > { %1539 = vtanh.f32 %v627_v23 }
 0x140   : > { %v629_v24 = vpop.f32.mrf.mxu1 }
 0x141   : > { %v1540_v25 = vpop.eup %1539  ;;  %v630_v26 = vadd.f32 %v1925_v15, %v629_v24 }
 0x142   : > { %1405 = vmatmul.msk.f32.gmra.mxu2 %vm690_vm2, %v1540_v25 }
 0x143   : > { %1541 = vtanh.f32 %v630_v26 }
 0x148   : > { %v632_v27 = vpop.f32.mrf.mxu1 }
 0x149   : > { %v1542_v28 = vpop.eup %1541  ;;  %v633_v29 = vadd.f32 %v1925_v15, %v632_v27 }
 0x14a   : > { %1406 = vmatmul.msk.f32.gmra.mxu2 %vm690_vm2, %v1542_v28 }
 0x14b   : > { %1543 = vtanh.f32 %v633_v29 }
 0x150   : > { %v635_v30 = vpop.f32.mrf.mxu1 }
 0x151   : > { %v1544_v31 = vpop.eup %1543  ;;  %v636_v32 = vadd.f32 %v1925_v15, %v635_v30 }
 0x152   : > { %1407 = vmatmul.msk.f32.gmra.mxu2 %vm690_vm2, %v1544_v31 }
 0x153   : > { %1545 = vtanh.f32 %v636_v32 }
 0x158   : > { %v638_v33 = vpop.f32.mrf.mxu1 }
 0x159   : > { %v1546_v34 = vpop.eup %1545  ;;  %v639_v35 = vadd.f32 %v1925_v15, %v638_v33 }
 0x15a   : > { %1408 = vmatmul.msk.f32.gmra.mxu2 %vm690_vm2, %v1546_v34 }
 0x15b   : > { %1547 = vtanh.f32 %v639_v35 }
 0x160   : > { %v641_v36 = vpop.f32.mrf.mxu1 }
 0x161   : > { %v1548_v37 = vpop.eup %1547  ;;  %v642_v38 = vadd.f32 %v1925_v15, %v641_v36 }
 0x162   : > { %1409 = vmatmul.msk.f32.gmra.mxu2 %vm690_vm2, %v1548_v37  ;;  %v1993_v37 = vld [vmem:[%s2119_s8] ss:$0 sm:$0xff] }
 0x163   : > { %1549 = vtanh.f32 %v642_v38 }
 0x168   : > { %v644_v39 = vpop.f32.mrf.mxu1 }
 0x169   : > { %v1550_v40 = vpop.eup %1549  ;;  %v645_v41 = vadd.f32 %v1925_v15, %v644_v39 }
 0x16a   : > { %1410 = vmatmul.msk.f32.gmra.mxu2 %vm690_vm2, %v1550_v40 }
 0x16b   : > { %1551 = vtanh.f32 %v645_v41 }
 0x170   : > { %v647_v42 = vpop.f32.mrf.mxu1 }
 0x171   : > { %v1552_v43 = vpop.eup %1551  ;;  %v648_v44 = vadd.f32 %v1925_v15, %v647_v42 }
 0x172   : > { %1411 = vmatmul.msk.f32.gmra.mxu2 %vm690_vm2, %v1552_v43 }
 0x173   : > { %1553 = vtanh.f32 %v648_v44 }
 0x178   : > { %v650_v45 = vpop.f32.mrf.mxu1 }
 0x179   : > { %v1554_v46 = vpop.eup %1553  ;;  %v651_v47 = vadd.f32 %v1925_v15, %v650_v45 }
 0x17a   : > { %1412 = vmatmul.msk.f32.gmra.mxu2 %vm690_vm2, %v1554_v46 }
 0x17b   : > { %1555 = vtanh.f32 %v651_v47 }
 0x180   : > { %v653_v48 = vpop.f32.mrf.mxu1 }
 0x181   : > { %v1556_v49 = vpop.eup %1555  ;;  %v654_v50 = vadd.f32 %v1925_v15, %v653_v48 }
 0x182   : > { %1413 = vmatmul.msk.f32.gmra.mxu2 %vm690_vm2, %v1556_v49 }
 0x183   : > { %1557 = vtanh.f32 %v654_v50 }
 0x188   : > { %v656_v51 = vpop.f32.mrf.mxu1 }
 0x189   : > { %v1558_v52 = vpop.eup %1557  ;;  %v657_v53 = vadd.f32 %v1925_v15, %v656_v51  ;;  %v1229_v51 = vld [vmem:[%s2120_s9] sm:$0x1] }
 0x18a   : > { %1414 = vmatmul.msk.f32.gmra.mxu2 %vm690_vm2, %v1558_v52  ;;  %v1230_v52 = vld [vmem:[%s2121_s10] sm:$0x1] }
 0x18b   : > { %1559 = vtanh.f32 %v657_v53 }
 0x190   : > { %v659_v56 = vpop.f32.mrf.mxu1 }
 0x191   : > { %v1560_v57 = vpop.eup %1559  ;;  %v660_v58 = vadd.f32 %v1925_v15, %v659_v56  ;;  %v1231_v56 = vsub.f32 %v1230_v52, %v1229_v51 }
 0x192   : > { %1415 = vmatmul.msk.f32.gmra.mxu2 %vm690_vm2, %v1560_v57 }
 0x193   : > { %1561 = vtanh.f32 %v660_v58 }
 0x198   : > { %v662_v61 = vpop.f32.mrf.mxu1 }
 0x199   : > { %v1562_v62 = vpop.eup %1561  ;;  %v663_v63 = vadd.f32 %v1925_v15, %v662_v61 }
 0x19a   : > { %1416 = vmatmul.msk.f32.gmra.mxu2 %vm690_vm2, %v1562_v62 }
 0x19b   : > { %1563 = vtanh.f32 %v663_v63 }
 0x1a0   : > { %v665_v0 = vpop.f32.mrf.mxu1 }
 0x1a1   : > { %v1564_v1 = vpop.eup %1563  ;;  %v666_v2 = vadd.f32 %v1925_v15, %v665_v0  ;;  %v2006_v0 = vperm.slane %v1231_v56, 0 }
 0x1a2   : > { %1417 = vmatmul.msk.f32.gmra.mxu2 %vm690_vm2, %v1564_v1 }
 0x1a3   : > { %1565 = vtanh.f32 %v666_v2 }
 0x1a9   : > { %v1566_v3 = vpop.eup %1565 }
 0x1aa   : > { %1418 = vmatmul.msk.f32.gmra.mxu2 %vm690_vm2, %v1566_v3 }
 0x1b5   : > { %v756_v5 = vpop.f32.mrf.mxu2 }
 0x1b6   : > { %v757_v6 = vadd.f32 %v1500_v4, %v756_v5 }
 0x1b8   : > { %1419 = vmatmul.msk.f32.vlgmr.msra.gmra.mxu3 %vm554_vm1, %v757_v6  ;;  %v2013_v6 = vld [vmem:[%s2120_s9] ss:$0 sm:$0xff] }
 0x1bd   : > { %v759_v7 = vpop.f32.mrf.mxu2 }
 0x1be   : > { %v760_v8 = vadd.f32 %v1500_v4, %v759_v7 }
 0x1c0   : > { %1420 = vmatmul.msk.f32.gmra.mxu3 %vm554_vm1, %v760_v8 }
 0x1c5   : > { %v762_v9 = vpop.f32.mrf.mxu2 }
 0x1c6   : > { %v763_v10 = vadd.f32 %v1500_v4, %v762_v9 }
 0x1c8   : > { %1421 = vmatmul.msk.f32.gmra.mxu3 %vm554_vm1, %v763_v10 }
 0x1cd   : > { %v765_v11 = vpop.f32.mrf.mxu2 }
 0x1ce   : > { %v766_v12 = vadd.f32 %v1500_v4, %v765_v11 }
 0x1d0   : > { %1422 = vmatmul.msk.f32.gmra.mxu3 %vm554_vm1, %v766_v12 }
 0x1d5   : > { %v768_v13 = vpop.f32.mrf.mxu2 }
 0x1d6   : > { %v769_v14 = vadd.f32 %v1500_v4, %v768_v13 }
 0x1d8   : > { %1423 = vmatmul.msk.f32.gmra.mxu3 %vm554_vm1, %v769_v14 }
 0x1dd   : > { %v771_v15 = vpop.f32.mrf.mxu2 }
 0x1de   : > { %v772_v16 = vadd.f32 %v1500_v4, %v771_v15 }
 0x1e0   : > { %1424 = vmatmul.msk.f32.gmra.mxu3 %vm554_vm1, %v772_v16 }
 0x1e5   : > { %v774_v17 = vpop.f32.mrf.mxu2 }
 0x1e6   : > { %v775_v18 = vadd.f32 %v1500_v4, %v774_v17 }
 0x1e8   : > { %1425 = vmatmul.msk.f32.gmra.mxu3 %vm554_vm1, %v775_v18 }
 0x1ed   : > { %v777_v19 = vpop.f32.mrf.mxu2 }
 0x1ee   : > { %v778_v20 = vadd.f32 %v1500_v4, %v777_v19 }
 0x1f0   : > { %1426 = vmatmul.msk.f32.gmra.mxu3 %vm554_vm1, %v778_v20 }
 0x1f5   : > { %v780_v21 = vpop.f32.mrf.mxu2 }
 0x1f6   : > { %v781_v22 = vadd.f32 %v1500_v4, %v780_v21 }
 0x1f8   : > { %1427 = vmatmul.msk.f32.gmra.mxu3 %vm554_vm1, %v781_v22 }
 0x1fd   : > { %v783_v23 = vpop.f32.mrf.mxu2 }
 0x1fe   : > { %v784_v24 = vadd.f32 %v1500_v4, %v783_v23 }
 0x200   : > { %1428 = vmatmul.msk.f32.gmra.mxu3 %vm554_vm1, %v784_v24 }
 0x205   : > { %v786_v25 = vpop.f32.mrf.mxu2 }
 0x206   : > { %v787_v26 = vadd.f32 %v1500_v4, %v786_v25 }
 0x208   : > { %1429 = vmatmul.msk.f32.gmra.mxu3 %vm554_vm1, %v787_v26 }
 0x20d   : > { %v789_v27 = vpop.f32.mrf.mxu2 }
 0x20e   : > { %v790_v28 = vadd.f32 %v1500_v4, %v789_v27 }
 0x210   : > { %1430 = vmatmul.msk.f32.gmra.mxu3 %vm554_vm1, %v790_v28 }
 0x215   : > { %v792_v29 = vpop.f32.mrf.mxu2 }
 0x216   : > { %v793_v30 = vadd.f32 %v1500_v4, %v792_v29 }
 0x218   : > { %1431 = vmatmul.msk.f32.gmra.mxu3 %vm554_vm1, %v793_v30 }
 0x21d   : > { %v795_v31 = vpop.f32.mrf.mxu2 }
 0x21e   : > { %v796_v32 = vadd.f32 %v1500_v4, %v795_v31 }
 0x220   : > { %1432 = vmatmul.msk.f32.gmra.mxu3 %vm554_vm1, %v796_v32 }
 0x225   : > { %v798_v33 = vpop.f32.mrf.mxu2 }
 0x226   : > { %v799_v34 = vadd.f32 %v1500_v4, %v798_v33 }
 0x228   : > { %1433 = vmatmul.msk.f32.gmra.mxu3 %vm554_vm1, %v799_v34 }
 0x22d   : > { %v801_v35 = vpop.f32.mrf.mxu2 }
 0x22e   : > { %v802_v36 = vadd.f32 %v1500_v4, %v801_v35 }
 0x230   : > { %1434 = vmatmul.msk.f32.gmra.mxu3 %vm554_vm1, %v802_v36 }
 0x23b   : > { %v877_v38 = vpop.f32.mrf.mxu3 }
 0x23c   : > { %v878_v39 = vadd.f32 %v1993_v37, %v877_v38 }
 0x23e   : > { %v1435_v40 = vmul.f32 -1.442695, %v878_v39 }
 0x240   : > { %1567 = vpow2.f32 %v1435_v40 }
 0x243   : > { %v880_v41 = vpop.f32.mrf.mxu3 }
 0x244   : > { %v881_v42 = vadd.f32 %v1993_v37, %v880_v41 }
 0x246   : > { %v1568_v43 = vpop.eup %1567  ;;  %v1436_v44 = vmul.f32 -1.442695, %v881_v42 }
 0x247   : > { %v973_v45 = vadd.f32 1.0, %v1568_v43 }
 0x248   : > { %1569 = vpow2.f32 %v1436_v44 }
 0x249   : > { %1571 = vrcp.f32 %v973_v45  ;;  %v1000_v57 = vand.u32 2147483648, %v973_v45  ;;  %v998_v60 = vand.u32 2147483647, %v973_v45  ;;  %vm994_vm4 = vweird.f32 %v973_v45 }
 0x24b   : > { %v883_v46 = vpop.f32.mrf.mxu3  ;;  %v1001_v3 = vor.u32 1.1754944e-38, %v1000_v57  ;;  %vm999_vm6 = vcmp.eq.f32.partialorder %v998_v60, 8.507059e+37 }
 0x24c   : > { %v884_v47 = vadd.f32 %v1993_v37, %v883_v46 }
 0x24e   : > { %v1570_v48 = vpop.eup %1569  ;;  %v1437_v49 = vmul.f32 -1.442695, %v884_v47 }
 0x24f   : > { %v1572_v50 = vpop.eup %1571  ;;  %v974_v53 = vadd.f32 1.0, %v1570_v48 }
 0x250   : > { %v990_v54 = vmul.f32 %v1572_v50, %v973_v45  ;;  %1573 = vpow2.f32 %v1437_v49  ;;  %vm995_vm3 = vweird.f32 %v1572_v50 }
 0x251   : > { %1575 = vrcp.f32 %v974_v53  ;;  %vm996_vm5 = vmor %vm994_vm4, %vm995_vm3  ;;  %v1013_v11 = vand.u32 2147483647, %v974_v53  ;;  %v1015_v12 = vand.u32 2147483648, %v974_v53  ;;  %vm1009_vm8 = vweird.f32 %v974_v53 }
 0x252   : > { %v991_v55 = vsub.f32 1.0, %v990_v54 }
 0x253   : > { %v886_v58 = vpop.f32.mrf.mxu3  ;;  %v1016_v21 = vor.u32 1.1754944e-38, %v1015_v12  ;;  %vm1014_vm10 = vcmp.eq.f32.partialorder %v1013_v11, 8.507059e+37 }
 0x254   : > { %v992_v59 = vmul.f32 %v1572_v50, %v991_v55  ;;  %v887_v61 = vadd.f32 %v1993_v37, %v886_v58 }
 0x256   : > { %v1574_v62 = vpop.eup %1573  ;;  %v993_v63 = vadd.f32 %v1572_v50, %v992_v59  ;;  %v1438_v1 = vmul.f32 -1.442695, %v887_v61 }
 0x257   : > { %v1576_v2 = vpop.eup %1575  ;;  %v975_v4 = vadd.f32 1.0, %v1574_v62 }
 0x258   : > { %v997_v5 = vsel %vm996_vm5, %v1572_v50, %v993_v63  ;;  %v1005_v7 = vmul.f32 %v1576_v2, %v974_v53  ;;  %1577 = vpow2.f32 %v1438_v1  ;;  %vm1010_vm7 = vweird.f32 %v1576_v2 }
 0x259   : > { %v1002_v8 = vsel %vm999_vm6, %v1001_v3, %v997_v5  ;;  %1579 = vrcp.f32 %v975_v4  ;;  %vm1011_vm9 = vmor %vm1009_vm8, %vm1010_vm7  ;;  %v1028_v28 = vand.u32 2147483647, %v975_v4  ;;  %v1030_v29 = vand.u32 2147483648, %v975_v4 }
 0x25a   : > { %v1235_v9 = vmul.f32 %v2006_v0, %v1002_v8  ;;  %v1006_v10 = vsub.f32 1.0, %v1005_v7  ;;  %vm1024_vm12 = vweird.f32 %v975_v4 }
 0x25b   : > { %v889_v13 = vpop.f32.mrf.mxu3  ;;  %v1031_v39 = vor.u32 1.1754944e-38, %v1030_v29  ;;  %vm1029_vm14 = vcmp.eq.f32.partialorder %v1028_v28, 8.507059e+37 }
 0x25c   : > { %v1254_v14 = vadd.f32 %v2013_v6, %v1235_v9  ;;  %v1007_v15 = vmul.f32 %v1576_v2, %v1006_v10  ;;  %v890_v16 = vadd.f32 %v1993_v37, %v889_v13 }
 0x25e   : > { %v1578_v17 = vpop.eup %1577  ;;  %1270 = vst [vmem:[%s2018_s19] sm:$0xff] %v1254_v14  ;;  %v1008_v18 = vadd.f32 %v1576_v2, %v1007_v15  ;;  %v1439_v19 = vmul.f32 -1.442695, %v890_v16 }
 0x25f   : > { %v1580_v20 = vpop.eup %1579  ;;  %v976_v22 = vadd.f32 1.0, %v1578_v17 }
 0x260   : > { %v1012_v23 = vsel %vm1011_vm9, %v1576_v2, %v1008_v18  ;;  %v1020_v24 = vmul.f32 %v1580_v20, %v975_v4  ;;  %1581 = vpow2.f32 %v1439_v19  ;;  %vm1025_vm11 = vweird.f32 %v1580_v20 }
 0x261   : > { %v1017_v25 = vsel %vm1014_vm10, %v1016_v21, %v1012_v23  ;;  %1583 = vrcp.f32 %v976_v22  ;;  %vm1026_vm13 = vmor %vm1024_vm12, %vm1025_vm11  ;;  %v1043_v46 = vand.u32 2147483647, %v976_v22  ;;  %v1045_v47 = vand.u32 2147483648, %v976_v22 }
 0x262   : > { %v1236_v26 = vmul.f32 %v2006_v0, %v1017_v25  ;;  %v1021_v27 = vsub.f32 1.0, %v1020_v24  ;;  %vm1039_vm0 = vweird.f32 %v976_v22 }
 0x263   : > { %v892_v30 = vpop.f32.mrf.mxu3  ;;  %v1046_v56 = vor.u32 1.1754944e-38, %v1045_v47  ;;  %vm1044_vm2 = vcmp.eq.f32.partialorder %v1043_v46, 8.507059e+37 }
 0x264   : > { %v1255_v31 = vadd.f32 %v2013_v6, %v1236_v26  ;;  %v1022_v32 = vmul.f32 %v1580_v20, %v1021_v27  ;;  %v893_v33 = vadd.f32 %v1993_v37, %v892_v30 }
 0x266   : > { %v1582_v34 = vpop.eup %1581  ;;  %1271 = vst [vmem:[%s2018_s19 + $0x8] sm:$0xff] %v1255_v31  ;;  %v1023_v35 = vadd.f32 %v1580_v20, %v1022_v32  ;;  %v1440_v36 = vmul.f32 -1.442695, %v893_v33 }
 0x267   : > { %v1584_v38 = vpop.eup %1583  ;;  %v977_v40 = vadd.f32 1.0, %v1582_v34 }
 0x268   : > { %v1027_v41 = vsel %vm1026_vm13, %v1580_v20, %v1023_v35  ;;  %v1035_v42 = vmul.f32 %v1584_v38, %v976_v22  ;;  %1585 = vpow2.f32 %v1440_v36  ;;  %vm1040_vm15 = vweird.f32 %v1584_v38 }
 0x269   : > { %v1032_v43 = vsel %vm1029_vm14, %v1031_v39, %v1027_v41  ;;  %1587 = vrcp.f32 %v977_v40  ;;  %vm1041_vm1 = vmor %vm1039_vm0, %vm1040_vm15  ;;  %v1058_v63 = vand.u32 2147483647, %v977_v40  ;;  %v1060_v1 = vand.u32 2147483648, %v977_v40 }
 0x26a   : > { %v1237_v44 = vmul.f32 %v2006_v0, %v1032_v43  ;;  %v1036_v45 = vsub.f32 1.0, %v1035_v42  ;;  %vm1054_vm4 = vweird.f32 %v977_v40 }
 0x26b   : > { %v895_v48 = vpop.f32.mrf.mxu3  ;;  %v1061_v11 = vor.u32 1.1754944e-38, %v1060_v1  ;;  %vm1059_vm6 = vcmp.eq.f32.partialorder %v1058_v63, 8.507059e+37 }
 0x26c   : > { %v1256_v49 = vadd.f32 %v2013_v6, %v1237_v44  ;;  %v1037_v50 = vmul.f32 %v1584_v38, %v1036_v45  ;;  %v896_v51 = vadd.f32 %v1993_v37, %v895_v48 }
 0x26e   : > { %v1586_v52 = vpop.eup %1585  ;;  %1272 = vst [vmem:[%s2018_s19 + $0x10] sm:$0xff] %v1256_v49  ;;  %v1038_v53 = vadd.f32 %v1584_v38, %v1037_v50  ;;  %v1441_v54 = vmul.f32 -1.442695, %v896_v51 }
 0x26f   : > { %v1588_v55 = vpop.eup %1587  ;;  %v978_v57 = vadd.f32 1.0, %v1586_v52 }
 0x270   : > { %v1042_v58 = vsel %vm1041_vm1, %v1584_v38, %v1038_v53  ;;  %v1050_v59 = vmul.f32 %v1588_v55, %v977_v40  ;;  %1589 = vpow2.f32 %v1441_v54  ;;  %vm1055_vm3 = vweird.f32 %v1588_v55 }
 0x271   : > { %v1047_v60 = vsel %vm1044_vm2, %v1046_v56, %v1042_v58  ;;  %1591 = vrcp.f32 %v978_v57  ;;  %vm1056_vm5 = vmor %vm1054_vm4, %vm1055_vm3  ;;  %v1073_v18 = vand.u32 2147483647, %v978_v57  ;;  %v1075_v19 = vand.u32 2147483648, %v978_v57 }
 0x272   : > { %v1238_v61 = vmul.f32 %v2006_v0, %v1047_v60  ;;  %v1051_v62 = vsub.f32 1.0, %v1050_v59  ;;  %vm1069_vm8 = vweird.f32 %v978_v57 }
 0x273   : > { %v898_v2 = vpop.f32.mrf.mxu3  ;;  %v1076_v28 = vor.u32 1.1754944e-38, %v1075_v19  ;;  %vm1074_vm10 = vcmp.eq.f32.partialorder %v1073_v18, 8.507059e+37 }
 0x274   : > { %v1257_v3 = vadd.f32 %v2013_v6, %v1238_v61  ;;  %v1052_v4 = vmul.f32 %v1588_v55, %v1051_v62  ;;  %v899_v5 = vadd.f32 %v1993_v37, %v898_v2 }
 0x276   : > { %v1590_v7 = vpop.eup %1589  ;;  %1273 = vst [vmem:[%s2018_s19 + $0x18] sm:$0xff] %v1257_v3  ;;  %v1053_v8 = vadd.f32 %v1588_v55, %v1052_v4  ;;  %v1442_v9 = vmul.f32 -1.442695, %v899_v5 }
 0x277   : > { %v1592_v10 = vpop.eup %1591  ;;  %v979_v12 = vadd.f32 1.0, %v1590_v7 }
 0x278   : > { %v1057_v13 = vsel %vm1056_vm5, %v1588_v55, %v1053_v8  ;;  %v1065_v14 = vmul.f32 %v1592_v10, %v978_v57  ;;  %1593 = vpow2.f32 %v1442_v9  ;;  %vm1070_vm7 = vweird.f32 %v1592_v10 }
 0x279   : > { %v1062_v15 = vsel %vm1059_vm6, %v1061_v11, %v1057_v13  ;;  %1595 = vrcp.f32 %v979_v12  ;;  %vm1071_vm9 = vmor %vm1069_vm8, %vm1070_vm7  ;;  %v1088_v35 = vand.u32 2147483647, %v979_v12  ;;  %v1090_v36 = vand.u32 2147483648, %v979_v12 }
 0x27a   : > { %v1239_v16 = vmul.f32 %v2006_v0, %v1062_v15  ;;  %v1066_v17 = vsub.f32 1.0, %v1065_v14  ;;  %vm1084_vm12 = vweird.f32 %v979_v12 }
 0x27b   : > { %v901_v20 = vpop.f32.mrf.mxu3  ;;  %v1091_v46 = vor.u32 1.1754944e-38, %v1090_v36  ;;  %vm1089_vm14 = vcmp.eq.f32.partialorder %v1088_v35, 8.507059e+37 }
 0x27c   : > { %v1258_v21 = vadd.f32 %v2013_v6, %v1239_v16  ;;  %v1067_v22 = vmul.f32 %v1592_v10, %v1066_v17  ;;  %v902_v23 = vadd.f32 %v1993_v37, %v901_v20 }
 0x27e   : > { %v1594_v24 = vpop.eup %1593  ;;  %1274 = vst [vmem:[%s2018_s19 + $0x20] sm:$0xff] %v1258_v21  ;;  %v1068_v25 = vadd.f32 %v1592_v10, %v1067_v22  ;;  %v1443_v26 = vmul.f32 -1.442695, %v902_v23 }
 0x27f   : > { %v1596_v27 = vpop.eup %1595  ;;  %v980_v29 = vadd.f32 1.0, %v1594_v24 }
 0x280   : > { %v1072_v30 = vsel %vm1071_vm9, %v1592_v10, %v1068_v25  ;;  %v1080_v31 = vmul.f32 %v1596_v27, %v979_v12  ;;  %1597 = vpow2.f32 %v1443_v26  ;;  %vm1085_vm11 = vweird.f32 %v1596_v27 }
 0x281   : > { %v1077_v32 = vsel %vm1074_vm10, %v1076_v28, %v1072_v30  ;;  %1599 = vrcp.f32 %v980_v29  ;;  %vm1086_vm13 = vmor %vm1084_vm12, %vm1085_vm11  ;;  %v1103_v53 = vand.u32 2147483647, %v980_v29  ;;  %v1105_v54 = vand.u32 2147483648, %v980_v29 }
 0x282   : > { %v1240_v33 = vmul.f32 %v2006_v0, %v1077_v32  ;;  %v1081_v34 = vsub.f32 1.0, %v1080_v31  ;;  %vm1099_vm0 = vweird.f32 %v980_v29 }
 0x283   : > { %v904_v38 = vpop.f32.mrf.mxu3  ;;  %v1106_v63 = vor.u32 1.1754944e-38, %v1105_v54  ;;  %vm1104_vm2 = vcmp.eq.f32.partialorder %v1103_v53, 8.507059e+37 }
 0x284   : > { %v1259_v39 = vadd.f32 %v2013_v6, %v1240_v33  ;;  %v1082_v40 = vmul.f32 %v1596_v27, %v1081_v34  ;;  %v905_v41 = vadd.f32 %v1993_v37, %v904_v38 }
 0x286   : > { %v1598_v42 = vpop.eup %1597  ;;  %1275 = vst [vmem:[%s2018_s19 + $0x28] sm:$0xff] %v1259_v39  ;;  %v1083_v43 = vadd.f32 %v1596_v27, %v1082_v40  ;;  %v1444_v44 = vmul.f32 -1.442695, %v905_v41 }
 0x287   : > { %v1600_v45 = vpop.eup %1599  ;;  %v981_v47 = vadd.f32 1.0, %v1598_v42 }
 0x288   : > { %v1087_v48 = vsel %vm1086_vm13, %v1596_v27, %v1083_v43  ;;  %v1095_v49 = vmul.f32 %v1600_v45, %v980_v29  ;;  %1601 = vpow2.f32 %v1444_v44  ;;  %vm1100_vm15 = vweird.f32 %v1600_v45 }
 0x289   : > { %v1092_v50 = vsel %vm1089_vm14, %v1091_v46, %v1087_v48  ;;  %1603 = vrcp.f32 %v981_v47  ;;  %vm1101_vm1 = vmor %vm1099_vm0, %vm1100_vm15  ;;  %v1118_v8 = vand.u32 2147483647, %v981_v47  ;;  %v1120_v9 = vand.u32 2147483648, %v981_v47 }
 0x28a   : > { %v1241_v51 = vmul.f32 %v2006_v0, %v1092_v50  ;;  %v1096_v52 = vsub.f32 1.0, %v1095_v49  ;;  %vm1114_vm4 = vweird.f32 %v981_v47 }
 0x28b   : > { %v907_v55 = vpop.f32.mrf.mxu3  ;;  %v1121_v18 = vor.u32 1.1754944e-38, %v1120_v9  ;;  %vm1119_vm6 = vcmp.eq.f32.partialorder %v1118_v8, 8.507059e+37 }
 0x28c   : > { %v1260_v56 = vadd.f32 %v2013_v6, %v1241_v51  ;;  %v1097_v57 = vmul.f32 %v1600_v45, %v1096_v52  ;;  %v908_v58 = vadd.f32 %v1993_v37, %v907_v55 }
 0x28e   : > { %v1602_v59 = vpop.eup %1601  ;;  %1276 = vst [vmem:[%s2018_s19 + $0x30] sm:$0xff] %v1260_v56  ;;  %v1098_v60 = vadd.f32 %v1600_v45, %v1097_v57  ;;  %v1445_v61 = vmul.f32 -1.442695, %v908_v58 }
 0x28f   : > { %v1604_v62 = vpop.eup %1603  ;;  %v982_v1 = vadd.f32 1.0, %v1602_v59 }
 0x290   : > { %v1102_v2 = vsel %vm1101_vm1, %v1600_v45, %v1098_v60  ;;  %v1110_v3 = vmul.f32 %v1604_v62, %v981_v47  ;;  %1605 = vpow2.f32 %v1445_v61  ;;  %vm1115_vm3 = vweird.f32 %v1604_v62 }
 0x291   : > { %v1107_v4 = vsel %vm1104_vm2, %v1106_v63, %v1102_v2  ;;  %1607 = vrcp.f32 %v982_v1  ;;  %vm1116_vm5 = vmor %vm1114_vm4, %vm1115_vm3  ;;  %v1133_v25 = vand.u32 2147483647, %v982_v1  ;;  %v1135_v26 = vand.u32 2147483648, %v982_v1 }
 0x292   : > { %v1242_v5 = vmul.f32 %v2006_v0, %v1107_v4  ;;  %v1111_v7 = vsub.f32 1.0, %v1110_v3  ;;  %vm1129_vm8 = vweird.f32 %v982_v1 }
 0x293   : > { %v910_v10 = vpop.f32.mrf.mxu3  ;;  %v1136_v35 = vor.u32 1.1754944e-38, %v1135_v26  ;;  %vm1134_vm10 = vcmp.eq.f32.partialorder %v1133_v25, 8.507059e+37 }
 0x294   : > { %v1261_v11 = vadd.f32 %v2013_v6, %v1242_v5  ;;  %v1112_v12 = vmul.f32 %v1604_v62, %v1111_v7  ;;  %v911_v13 = vadd.f32 %v1993_v37, %v910_v10 }
 0x296   : > { %v1606_v14 = vpop.eup %1605  ;;  %1277 = vst [vmem:[%s2018_s19 + $0x38] sm:$0xff] %v1261_v11  ;;  %v1113_v15 = vadd.f32 %v1604_v62, %v1112_v12  ;;  %v1446_v16 = vmul.f32 -1.442695, %v911_v13 }
 0x297   : > { %v1608_v17 = vpop.eup %1607  ;;  %v983_v19 = vadd.f32 1.0, %v1606_v14 }
 0x298   : > { %v1117_v20 = vsel %vm1116_vm5, %v1604_v62, %v1113_v15  ;;  %v1125_v21 = vmul.f32 %v1608_v17, %v982_v1  ;;  %1609 = vpow2.f32 %v1446_v16  ;;  %vm1130_vm7 = vweird.f32 %v1608_v17 }
 0x299   : > { %v1122_v22 = vsel %vm1119_vm6, %v1121_v18, %v1117_v20  ;;  %1611 = vrcp.f32 %v983_v19  ;;  %vm1131_vm9 = vmor %vm1129_vm8, %vm1130_vm7  ;;  %v1148_v43 = vand.u32 2147483647, %v983_v19  ;;  %v1150_v44 = vand.u32 2147483648, %v983_v19 }
 0x29a   : > { %v1243_v23 = vmul.f32 %v2006_v0, %v1122_v22  ;;  %v1126_v24 = vsub.f32 1.0, %v1125_v21  ;;  %vm1144_vm12 = vweird.f32 %v983_v19 }
 0x29b   : > { %v913_v27 = vpop.f32.mrf.mxu3  ;;  %v1151_v53 = vor.u32 1.1754944e-38, %v1150_v44  ;;  %vm1149_vm14 = vcmp.eq.f32.partialorder %v1148_v43, 8.507059e+37 }
 0x29c   : > { %v1262_v28 = vadd.f32 %v2013_v6, %v1243_v23  ;;  %v1127_v29 = vmul.f32 %v1608_v17, %v1126_v24  ;;  %v914_v30 = vadd.f32 %v1993_v37, %v913_v27 }
 0x29e   : > { %v1610_v31 = vpop.eup %1609  ;;  %1278 = vst [vmem:[%s2018_s19 + $0x40] sm:$0xff] %v1262_v28  ;;  %v1128_v32 = vadd.f32 %v1608_v17, %v1127_v29  ;;  %v1447_v33 = vmul.f32 -1.442695, %v914_v30 }
 0x29f   : > { %v1612_v34 = vpop.eup %1611  ;;  %v984_v36 = vadd.f32 1.0, %v1610_v31 }
 0x2a0   : > { %v1132_v38 = vsel %vm1131_vm9, %v1608_v17, %v1128_v32  ;;  %v1140_v39 = vmul.f32 %v1612_v34, %v983_v19  ;;  %1613 = vpow2.f32 %v1447_v33  ;;  %vm1145_vm11 = vweird.f32 %v1612_v34 }
 0x2a1   : > { %v1137_v40 = vsel %vm1134_vm10, %v1136_v35, %v1132_v38  ;;  %1615 = vrcp.f32 %v984_v36  ;;  %vm1146_vm13 = vmor %vm1144_vm12, %vm1145_vm11  ;;  %v1163_v60 = vand.u32 2147483647, %v984_v36  ;;  %v1165_v61 = vand.u32 2147483648, %v984_v36 }
 0x2a2   : > { %v1244_v41 = vmul.f32 %v2006_v0, %v1137_v40  ;;  %v1141_v42 = vsub.f32 1.0, %v1140_v39  ;;  %vm1159_vm0 = vweird.f32 %v984_v36 }
 0x2a3   : > { %v916_v45 = vpop.f32.mrf.mxu3  ;;  %v1166_v8 = vor.u32 1.1754944e-38, %v1165_v61  ;;  %vm1164_vm2 = vcmp.eq.f32.partialorder %v1163_v60, 8.507059e+37 }
 0x2a4   : > { %v1263_v46 = vadd.f32 %v2013_v6, %v1244_v41  ;;  %v1142_v47 = vmul.f32 %v1612_v34, %v1141_v42  ;;  %v917_v48 = vadd.f32 %v1993_v37, %v916_v45 }
 0x2a6   : > { %v1614_v49 = vpop.eup %1613  ;;  %1279 = vst [vmem:[%s2018_s19 + $0x48] sm:$0xff] %v1263_v46  ;;  %v1143_v50 = vadd.f32 %v1612_v34, %v1142_v47  ;;  %v1448_v51 = vmul.f32 -1.442695, %v917_v48 }
 0x2a7   : > { %v1616_v52 = vpop.eup %1615  ;;  %v985_v54 = vadd.f32 1.0, %v1614_v49 }
 0x2a8   : > { %v1147_v55 = vsel %vm1146_vm13, %v1612_v34, %v1143_v50  ;;  %v1155_v56 = vmul.f32 %v1616_v52, %v984_v36  ;;  %1617 = vpow2.f32 %v1448_v51  ;;  %vm1160_vm15 = vweird.f32 %v1616_v52 }
 0x2a9   : > { %v1152_v57 = vsel %vm1149_vm14, %v1151_v53, %v1147_v55  ;;  %1619 = vrcp.f32 %v985_v54  ;;  %vm1161_vm1 = vmor %vm1159_vm0, %vm1160_vm15  ;;  %v1178_v15 = vand.u32 2147483647, %v985_v54  ;;  %v1180_v16 = vand.u32 2147483648, %v985_v54 }
 0x2aa   : > { %v1245_v58 = vmul.f32 %v2006_v0, %v1152_v57  ;;  %v1156_v59 = vsub.f32 1.0, %v1155_v56  ;;  %vm1174_vm4 = vweird.f32 %v985_v54 }
 0x2ab   : > { %v919_v62 = vpop.f32.mrf.mxu3  ;;  %v1181_v25 = vor.u32 1.1754944e-38, %v1180_v16  ;;  %vm1179_vm6 = vcmp.eq.f32.partialorder %v1178_v15, 8.507059e+37 }
 0x2ac   : > { %v1264_v63 = vadd.f32 %v2013_v6, %v1245_v58  ;;  %v1157_v1 = vmul.f32 %v1616_v52, %v1156_v59  ;;  %v920_v2 = vadd.f32 %v1993_v37, %v919_v62 }
 0x2ae   : > { %v1618_v3 = vpop.eup %1617  ;;  %1280 = vst [vmem:[%s2018_s19 + $0x50] sm:$0xff] %v1264_v63  ;;  %v1158_v4 = vadd.f32 %v1616_v52, %v1157_v1  ;;  %v1449_v5 = vmul.f32 -1.442695, %v920_v2 }
 0x2af   : > { %v1620_v7 = vpop.eup %1619  ;;  %v986_v9 = vadd.f32 1.0, %v1618_v3 }
 0x2b0   : > { %v1162_v10 = vsel %vm1161_vm1, %v1616_v52, %v1158_v4  ;;  %v1170_v11 = vmul.f32 %v1620_v7, %v985_v54  ;;  %1621 = vpow2.f32 %v1449_v5  ;;  %vm1175_vm3 = vweird.f32 %v1620_v7 }
 0x2b1   : > { %v1167_v12 = vsel %vm1164_vm2, %v1166_v8, %v1162_v10  ;;  %1623 = vrcp.f32 %v986_v9  ;;  %vm1176_vm5 = vmor %vm1174_vm4, %vm1175_vm3  ;;  %v1193_v34 = vand.u32 2147483647, %v986_v9  ;;  %vm1189_vm8 = vweird.f32 %v986_v9 }
 0x2b2   : > { %v1246_v13 = vmul.f32 %v2006_v0, %v1167_v12  ;;  %v1171_v14 = vsub.f32 1.0, %v1170_v11 }
 0x2b3   : > { %v922_v17 = vpop.f32.mrf.mxu3  ;;  %vm1194_vm10 = vcmp.eq.f32.partialorder %v1193_v34, 8.507059e+37 }
 0x2b4   : > { %v1265_v18 = vadd.f32 %v2013_v6, %v1246_v13  ;;  %v1172_v19 = vmul.f32 %v1620_v7, %v1171_v14  ;;  %v923_v20 = vadd.f32 %v1993_v37, %v922_v17  ;;  %v1195_v37 = vand.u32 2147483648, %v986_v9 }
 0x2b6   : > { %v1622_v21 = vpop.eup %1621  ;;  %1281 = vst [vmem:[%s2018_s19 + $0x58] sm:$0xff] %v1265_v18  ;;  %v1173_v22 = vadd.f32 %v1620_v7, %v1172_v19  ;;  %v1450_v23 = vmul.f32 -1.442695, %v923_v20  ;;  %v1196_v39 = vor.u32 1.1754944e-38, %v1195_v37 }
 0x2b7   : > { %v1624_v24 = vpop.eup %1623  ;;  %v987_v26 = vadd.f32 1.0, %v1622_v21 }
 0x2b8   : > { %v1177_v27 = vsel %vm1176_vm5, %v1620_v7, %v1173_v22  ;;  %v1185_v28 = vmul.f32 %v1624_v24, %v986_v9  ;;  %1625 = vpow2.f32 %v1450_v23  ;;  %vm1190_vm7 = vweird.f32 %v1624_v24 }
 0x2b9   : > { %v1182_v29 = vsel %vm1179_vm6, %v1181_v25, %v1177_v27  ;;  %1627 = vrcp.f32 %v987_v26  ;;  %vm1191_vm9 = vmor %vm1189_vm8, %vm1190_vm7  ;;  %v1210_v46 = vand.u32 2147483648, %v987_v26  ;;  %v1208_v49 = vand.u32 2147483647, %v987_v26 }
 0x2ba   : > { %v1247_v30 = vmul.f32 %v2006_v0, %v1182_v29  ;;  %v1186_v31 = vsub.f32 1.0, %v1185_v28  ;;  %vm1204_vm12 = vweird.f32 %v987_v26 }
 0x2bb   : > { %v1211_v52 = vor.u32 1.1754944e-38, %v1210_v46  ;;  %vm1209_vm14 = vcmp.eq.f32.partialorder %v1208_v49, 8.507059e+37 }
 0x2bc   : > { %v1266_v32 = vadd.f32 %v2013_v6, %v1247_v30  ;;  %v1187_v33 = vmul.f32 %v1624_v24, %v1186_v31 }
 0x2be   : > { %v1626_v35 = vpop.eup %1625  ;;  %1282 = vst [vmem:[%s2018_s19 + $0x60] sm:$0xff] %v1266_v32  ;;  %v1188_v36 = vadd.f32 %v1624_v24, %v1187_v33 }
 0x2bf   : > { %v1628_v38 = vpop.eup %1627  ;;  %v988_v40 = vadd.f32 1.0, %v1626_v35 }
 0x2c0   : > { %v1192_v41 = vsel %vm1191_vm9, %v1624_v24, %v1188_v36  ;;  %v1200_v42 = vmul.f32 %v1628_v38, %v987_v26  ;;  %vm1205_vm11 = vweird.f32 %v1628_v38 }
 0x2c1   : > { %v1197_v43 = vsel %vm1194_vm10, %v1196_v39, %v1192_v41  ;;  %1629 = vrcp.f32 %v988_v40  ;;  %vm1206_vm13 = vmor %vm1204_vm12, %vm1205_vm11  ;;  %v1225_v58 = vand.u32 2147483648, %v988_v40  ;;  %v1223_v61 = vand.u32 2147483647, %v988_v40 }
 0x2c2   : > { %v1248_v44 = vmul.f32 %v2006_v0, %v1197_v43  ;;  %v1201_v45 = vsub.f32 1.0, %v1200_v42  ;;  %vm1219_vm0 = vweird.f32 %v988_v40 }
 0x2c3   : > { %v1226_v63 = vor.u32 1.1754944e-38, %v1225_v58  ;;  %vm1224_vm2 = vcmp.eq.f32.partialorder %v1223_v61, 8.507059e+37 }
 0x2c4   : > { %v1267_v47 = vadd.f32 %v2013_v6, %v1248_v44  ;;  %v1202_v48 = vmul.f32 %v1628_v38, %v1201_v45 }
 0x2c6   : > { %1283 = vst [vmem:[%s2018_s19 + $0x68] sm:$0xff] %v1267_v47  ;;  %v1203_v50 = vadd.f32 %v1628_v38, %v1202_v48 }
 0x2c7   : > { %v1630_v51 = vpop.eup %1629 }
 0x2c8   : > { %v1207_v53 = vsel %vm1206_vm13, %v1628_v38, %v1203_v50  ;;  %v1215_v54 = vmul.f32 %v1630_v51, %v988_v40  ;;  %vm1220_vm15 = vweird.f32 %v1630_v51 }
 0x2c9   : > { %v1212_v55 = vsel %vm1209_vm14, %v1211_v52, %v1207_v53  ;;  %vm1221_vm1 = vmor %vm1219_vm0, %vm1220_vm15 }
 0x2ca   : > { %v1249_v56 = vmul.f32 %v2006_v0, %v1212_v55  ;;  %v1216_v57 = vsub.f32 1.0, %v1215_v54 }
 0x2cc   : > { %v1268_v59 = vadd.f32 %v2013_v6, %v1249_v56  ;;  %v1217_v60 = vmul.f32 %v1630_v51, %v1216_v57 }
 0x2ce   : > { %1284 = vst [vmem:[%s2018_s19 + $0x70] sm:$0xff] %v1268_v59  ;;  %v1218_v62 = vadd.f32 %v1630_v51, %v1217_v60 }
 0x2d0   : > { %v1222_v1 = vsel %vm1221_vm1, %v1630_v51, %v1218_v62 }
 0x2d1   : > { %v1227_v2 = vsel %vm1224_vm2, %v1226_v63, %v1222_v1 }
 0x2d2   : > { %v1250_v3 = vmul.f32 %v2006_v0, %v1227_v2 }
 0x2d4   : > { %v1269_v4 = vadd.f32 %v2013_v6, %v1250_v3 }
 0x2d6   : > { %1285 = vst [vmem:[%s2018_s19 + $0x78] sm:$0xff] %v1269_v4 }
 0x2d7   : > { %1658 = shalt.err (!%p1655_p3)
}
 0x2d8   : > { %s1695_s16 = smov 128   ;;  %s1696_s19 = smov 8  }
 0x2d9   : > { %1457 = dma.vmem_to_hbm [thread:$0]  (%p1795_p5), %s1300_s21, 2048, %s1302_s12, %s1287_s13, %s1695_s16, %s1695_s16, %s1696_s19  }
 0x2da PF: > { %p1463_p4 = scmp.ge.s32.totalorder %s1693_s20, 2  ;;  %s1316_s30 = sand.u32 1, %s1681_s17  }
 0x2db   : > { %s1317_s22 = scalar_lea.sflag [#allocation3], %s1316_s30 }
 0x2dc   : > { %p1460_p7 = pnand %p1463_p4, %p1799_p6 }
 0x2de   : > { %p1461_p8 = pneg %p1460_p7 }
 0x2e0   : > { %1676 = dma.done.wait (%p1461_p8), %s1317_s22, 2048  }
 0x2e1   : > { %1678 = vsyncadd (%p1461_p8), %s1317_s22, 4294965248  ;;  %s2128_s15 = sld [smem:[#allocation5_spill]]  ;;  %p21_p9 = scmp.ge.s32.totalorder %s1782_s23, 6  }
 0x2e2   : > { %s2129_s19 = sld [smem:[#allocation6_spill]]  ;;  %s2130_s17 = smov %s1685_s18 }
 0x2e3   : > { %s2132_s20 = smov %s1782_s23  ;;  %23 = sbr.rel (!%p21_p9) target bundleno = 3 (0x3), region = 99 }
 0x2e7   : > { %s2131_s18 = smov %s2128_s15 }
 0x2e8   :  { %1323 = vsyncpa [#allocation3], 1 }
 0x2e9   :  { %1325 = vsyncpa [#allocation3 + $0x1], 1 }

</bundles_post_ra>
